<compile_context>
chip_gen: v7x
topology: tpu7x:2x2x1
jax: 0.10.0
libtpu: 0.0.40
codegen_flags: <defaults>
</compile_context>

<pallas_src>
import math

import jax
import jax.numpy as jnp
import numpy as np
from jax.experimental import pallas as pl
from jax.experimental.pallas import tpu as pltpu


def lstm_net_kernel(x_ref, wih_ref, whh_ref, b_ref, wstep_ref, rfold_ref,
                    bfc_ref, out_ref, gx_ref):
    """Fused LSTM -> AvgPool1d -> Linear -> softmax.

    x_ref:     (T*B, D)     time-major inputs, row r = (t, b) with r = t*B + b
    wih_ref:   (D, 4H)      transposed Wih, gates (i,f,o,g), i/f/o cols * 0.5
    whh_ref:   (H, 4H)      transposed Whh, same permutation/scaling
    b_ref:     (1, 4H)      b_ih + b_hh, same permutation/scaling
    wstep_ref: (S*H, B*O)   per-step fused AvgPool+FC weights, S = T // B
    rfold_ref: (B*O, O)     lane-fold matrix: rfold[c, o] = [c % O == o]
    bfc_ref:   (1, O)       FC bias
    out_ref:   (B, O)       softmax probabilities
    gx_ref:    (T*B, 4H)    VMEM scratch for the hoisted input projection
    """
    TB = x_ref.shape[0]
    H = whh_ref.shape[0]
    B, O = out_ref.shape
    T = TB // B
    S = T // B                      # timesteps per output-row group (T % B == 0)

    # Hoisted input projection + bias for every timestep: one MXU matmul,
    # staged to VMEM so the unrolled loop only keeps a (B, 4H) slice live.
    gx_ref[...] = (jnp.dot(x_ref[...], wih_ref[...],
                           preferred_element_type=jnp.float32) + b_ref[...])

    whh = whh_ref[...]
    h = jnp.zeros((B, H), jnp.float32)
    c = jnp.zeros((B, H), jnp.float32)

    # Hoisted masks (JAX does not CSE broadcasts/iota — build once).
    col = jax.lax.broadcasted_iota(jnp.int32, (B, B * O), 1)
    row = jax.lax.broadcasted_iota(jnp.int32, (B, B * O), 0)
    dmask = jnp.logical_and(col >= row * O, col < (row + 1) * O)
    zero_wide = jnp.zeros((B, B * O), jnp.float32)

    lg = zero_wide                  # row g holds group g's folded FC partials
    acc = zero_wide                 # current group's (B, B*O) accumulator

    # Recurrence, fully unrolled (T is a small static trip count).
    for t in range(T):
        s = t % S
        g_idx = t // S

        # ---- serial h -> h critical path --------------------------------
        gpre = gx_ref[t * B:(t + 1) * B, :] + jnp.dot(
            h, whh, preferred_element_type=jnp.float32)           # (B, 4H)
        y = jnp.tanh(gpre)          # ONE EUP pass over all 4H lanes
        i_g = 0.5 * y[:, 0:H] + 0.5                               # sigmoid(i)
        f_g = 0.5 * y[:, H:2 * H] + 0.5                           # sigmoid(f)
        o_g = 0.5 * y[:, 2 * H:3 * H] + 0.5                       # sigmoid(o)
        g_g = y[:, 3 * H:4 * H]                                   # tanh(g)
        c = f_g * c + i_g * g_g
        h = o_g * jnp.tanh(c)

        # ---- fused AvgPool + FC contribution (off the critical path) ----
        acc = acc + jnp.dot(h, wstep_ref[s * H:(s + 1) * H, :],
                            preferred_element_type=jnp.float32)   # (B, B*O)
        if s == S - 1:
            # Keep block b of accumulator row b, collapse rows to (1, B*O),
            # and park the result in row g_idx of lg.
            srow = jnp.sum(jnp.where(dmask, acc, 0.0), axis=0, keepdims=True)
            lg = lg + jnp.where(row == g_idx, srow, 0.0)
            acc = zero_wide

    # Fold the B*O lanes back to O logits lanes, add bias, full-block softmax.
    logits = jnp.dot(lg, rfold_ref[...],
                     preferred_element_type=jnp.float32) + bfc_ref[...]
    m = jnp.max(logits, axis=-1, keepdims=True)
    e = jnp.exp(logits - m)
    out_ref[...] = e / jnp.sum(e, axis=-1, keepdims=True)


def lstm_net_forward(x, raw_params, *, hidden_dim, out_dim, kernel_size,
                     max_length):
    """Wrapper: builds fused/permuted weights and launches one pallas_call."""
    w_ih, w_hh, b_ih, b_hh, w_fc, b_fc = raw_params
    B = x.shape[0]
    T, H, k, O = max_length, hidden_dim, kernel_size, out_dim
    P = H // k
    D = x.size // (T * B)
    # The fused pool+FC path reproduces PyTorch's batch-mixing
    # `.view(batch, -1)` exactly, assuming max_length is a multiple of batch.
    assert T % B == 0, "fused pool+FC path requires max_length % batch == 0"
    S = T // B

    # PyTorch: x.view(max_length, batch, -1) — raw row-major reshape (NOT a
    # transpose); collapsing to (T*B, D) keeps the same flat buffer.
    x_2d = jnp.reshape(x.astype(jnp.float32), (T * B, D))

    # Gate permutation (i,f,g,o) -> (i,f,o,g) and fold the 0.5 sigmoid input
    # scale into the i/f/o columns, so the kernel needs one tanh per step.
    def prep_gates(w4h):
        i, f, g, o = jnp.split(w4h.astype(jnp.float32), 4, axis=-1)
        return jnp.concatenate([0.5 * i, 0.5 * f, 0.5 * o, g], axis=-1)

    wih_t = prep_gates(w_ih.T)                     # (D, 4H)
    whh_t = prep_gates(w_hh.T)                     # (H, 4H)
    bias = prep_gates((b_ih + b_hh)[None, :])      # (1, 4H)

    # AvgPool1d as a matrix (channels >= P*k dropped, matching floor behaviour),
    # then pre-fuse pool+FC into per-step weights W_step (S*H, B*O): column
    # block b of row block s is pool_mat @ W_fc.T[(s*B+b)*P:(s*B+b+1)*P, :].
    pool_mat = (jnp.equal(jnp.arange(H)[:, None] // k,
                          jnp.arange(P)[None, :]).astype(jnp.float32)
                / float(k))                        # (H, P)
    wfc_t = w_fc.T.astype(jnp.float32)             # (T*P, O)
    w_step = jnp.concatenate(
        [jnp.concatenate(
            [pool_mat @ wfc_t[(s * B + b) * P:(s * B + b + 1) * P, :]
             for b in range(B)], axis=1)
         for s in range(S)], axis=0)               # (S*H, B*O)

    # Lane-fold matrix used once at the end of the kernel.
    rfold = jnp.equal(jnp.arange(B * O)[:, None] % O,
                      jnp.arange(O)[None, :]).astype(jnp.float32)   # (B*O, O)

    bfc_2d = b_fc.astype(jnp.float32)[None, :]     # (1, O)

    return pl.pallas_call(
        lstm_net_kernel,
        out_shape=jax.ShapeDtypeStruct((B, O), jnp.float32),
        in_specs=[pl.BlockSpec(memory_space=pltpu.MemorySpace.VMEM)] * 7,
        out_specs=pl.BlockSpec(memory_space=pltpu.MemorySpace.VMEM),
        scratch_shapes=[pltpu.VMEM((T * B, 4 * H), jnp.float32)],
    )(x_2d, wih_t, whh_t, bias, w_step, rfold, bfc_2d)


def reference_forward(x, raw_params, *, hidden_dim, kernel_size, max_length):
    """Pure-JAX reference mirroring PyTorch semantics."""
    w_ih, w_hh, b_ih, b_hh, w_fc, b_fc = raw_params
    B = x.shape[0]
    T, H, k = max_length, hidden_dim, kernel_size
    D = x.size // (T * B)
    xs = jnp.reshape(x, (T, B, D))
    h = jnp.zeros((B, H), jnp.float32)
    c = jnp.zeros((B, H), jnp.float32)
    outs = []
    for t in range(T):
        gates = xs[t] @ w_ih.T + b_ih + h @ w_hh.T + b_hh
        i = jax.nn.sigmoid(gates[:, :H])
        f = jax.nn.sigmoid(gates[:, H:2 * H])
        g = jnp.tanh(gates[:, 2 * H:3 * H])
        o = jax.nn.sigmoid(gates[:, 3 * H:])
        c = f * c + i * g
        h = o * jnp.tanh(c)
        outs.append(h)
    out = jnp.stack(outs)                      # (T, B, H)
    P = H // k
    pooled = out[..., :P * k].reshape(T, B, P, k).mean(-1)
    z = pooled.reshape(B, -1)
    logits = z @ w_fc.T + b_fc
    return jax.nn.softmax(logits, axis=1)


if __name__ == "__main__":
    # Small, module-consistent sizes.
    batch = 2
    input_dim = 16
    hidden_dim = 32
    out_dim = 10
    kernel_size = 4
    max_length = 8
    fc_in_dim = hidden_dim // kernel_size * max_length  # 64

    key = jax.random.PRNGKey(0)
    kx, k1, k2, k3, k4, k5, k6 = jax.random.split(key, 7)

    # Deterministic init matching PyTorch default uniform bounds.
    b_lstm = 1.0 / math.sqrt(hidden_dim)
    w_ih = jax.random.uniform(k1, (4 * hidden_dim, input_dim), jnp.float32,
                              -b_lstm, b_lstm)
    w_hh = jax.random.uniform(k2, (4 * hidden_dim, hidden_dim), jnp.float32,
                              -b_lstm, b_lstm)
    b_ih = jax.random.uniform(k3, (4 * hidden_dim,), jnp.float32, -b_lstm, b_lstm)
    b_hh = jax.random.uniform(k4, (4 * hidden_dim,), jnp.float32, -b_lstm, b_lstm)
    b_fc_bound = 1.0 / math.sqrt(fc_in_dim)
    w_fc = jax.random.uniform(k5, (out_dim, fc_in_dim), jnp.float32,
                              -b_fc_bound, b_fc_bound)
    b_fc = jax.random.uniform(k6, (out_dim,), jnp.float32, -b_fc_bound, b_fc_bound)

    raw_params = (w_ih, w_hh, b_ih, b_hh, w_fc, b_fc)
    x = jax.random.normal(kx, (batch, max_length, input_dim), jnp.float32)

    out = lstm_net_forward(x, raw_params, hidden_dim=hidden_dim,
                           out_dim=out_dim, kernel_size=kernel_size,
                           max_length=max_length)
    out = jax.block_until_ready(out)

    ref = reference_forward(x, raw_params, hidden_dim=hidden_dim,
                            kernel_size=kernel_size, max_length=max_length)
    np.testing.assert_allclose(np.asarray(out), np.asarray(ref),
                               rtol=1e-3, atol=1e-3)

    print("KERNEL_OK")
</pallas_src>

<mosaic_0001>
module attributes {stable_mosaic.version = 11 : i64} {
  func.func @lstm_net_kernel(%arg0: memref<16x16xf32, #tpu.memory_space<vmem>>, %arg1: memref<16x128xf32, #tpu.memory_space<vmem>>, %arg2: memref<32x128xf32, #tpu.memory_space<vmem>>, %arg3: memref<1x128xf32, #tpu.memory_space<vmem>>, %arg4: memref<128x20xf32, #tpu.memory_space<vmem>>, %arg5: memref<20x10xf32, #tpu.memory_space<vmem>>, %arg6: memref<1x10xf32, #tpu.memory_space<vmem>>, %arg7: memref<2x10xf32, #tpu.memory_space<vmem>>, %arg8: memref<16x128xf32, #tpu.memory_space<vmem>>) attributes {dimension_semantics = [], scalar_prefetch = 0 : i64, scratch_operands = 1 : i64, tpu.core_type = #tpu.core_type<tc>} {
    %c0 = arith.constant 0 : index
    %c0_0 = arith.constant 0 : index
    %0 = vector.load %arg0[%c0, %c0_0] : memref<16x16xf32, #tpu.memory_space<vmem>>, vector<16x16xf32>
    %c0_1 = arith.constant 0 : index
    %c0_2 = arith.constant 0 : index
    %1 = vector.load %arg1[%c0_1, %c0_2] : memref<16x128xf32, #tpu.memory_space<vmem>>, vector<16x128xf32>
    %cst = arith.constant dense<0.000000e+00> : vector<16x128xf32>
    %2 = tpu.matmul %0, %1, %cst {dimension_numbers = #tpu.dot_dimension_numbers<[1], [0], [0], [1], [0, 0, 1, 1], [], []>} : vector<16x16xf32>, vector<16x128xf32>, vector<16x128xf32> -> vector<16x128xf32>
    %c0_3 = arith.constant 0 : index
    %c0_4 = arith.constant 0 : index
    %3 = vector.load %arg3[%c0_3, %c0_4] : memref<1x128xf32, #tpu.memory_space<vmem>>, vector<1x128xf32>
    %4 = vector.broadcast %3 : vector<1x128xf32> to vector<16x128xf32>
    %5 = arith.addf %2, %4 : vector<16x128xf32>
    %c0_5 = arith.constant 0 : index
    %c0_6 = arith.constant 0 : index
    %6 = vector.load %arg8[%c0_5, %c0_6] : memref<16x128xf32, #tpu.memory_space<vmem>>, vector<16x128xf32>
    tpu.vector_store %arg8[%c0_5, %c0_6], %5 {strides = array<i32>} : memref<16x128xf32, #tpu.memory_space<vmem>>, vector<16x128xf32>,
    %c0_7 = arith.constant 0 : index
    %c0_8 = arith.constant 0 : index
    %7 = vector.load %arg2[%c0_7, %c0_8] : memref<32x128xf32, #tpu.memory_space<vmem>>, vector<32x128xf32>
    %cst_9 = arith.constant 0.000000e+00 : f32
    %8 = vector.broadcast %cst_9 : f32 to vector<2x32xf32>
    %cst_10 = arith.constant 0.000000e+00 : f32
    %9 = vector.broadcast %cst_10 : f32 to vector<2x32xf32>
    %10 = tpu.iota {dimensions = array<i32: 1>} : vector<2x20xi32>
    %11 = tpu.iota {dimensions = array<i32: 0>} : vector<2x20xi32>
    %c10_i32 = arith.constant 10 : i32
    %12 = vector.broadcast %c10_i32 : i32 to vector<2x20xi32>
    %13 = arith.muli %11, %12 : vector<2x20xi32>
    %14 = arith.cmpi sge, %10, %13 : vector<2x20xi32>
    %c1_i32 = arith.constant 1 : i32
    %15 = vector.broadcast %c1_i32 : i32 to vector<2x20xi32>
    %16 = arith.addi %11, %15 : vector<2x20xi32>
    %c10_i32_11 = arith.constant 10 : i32
    %17 = vector.broadcast %c10_i32_11 : i32 to vector<2x20xi32>
    %18 = arith.muli %16, %17 : vector<2x20xi32>
    %19 = arith.cmpi slt, %10, %18 : vector<2x20xi32>
    %20 = arith.andi %14, %19 : vector<2x20xi1>
    %cst_12 = arith.constant 0.000000e+00 : f32
    %21 = vector.broadcast %cst_12 : f32 to vector<2x20xf32>
    %c0_13 = arith.constant 0 : index
    %c0_14 = arith.constant 0 : index
    %22 = vector.load %arg8[%c0_13, %c0_14] : memref<16x128xf32, #tpu.memory_space<vmem>>, vector<2x128xf32>
    %cst_15 = arith.constant dense<0.000000e+00> : vector<2x128xf32>
    %23 = tpu.matmul %8, %7, %cst_15 {dimension_numbers = #tpu.dot_dimension_numbers<[1], [0], [0], [1], [0, 0, 1, 1], [], []>} : vector<2x32xf32>, vector<32x128xf32>, vector<2x128xf32> -> vector<2x128xf32>
    %24 = arith.addf %22, %23 : vector<2x128xf32>
    %25 = math.tanh %24 : vector<2x128xf32>
    %26 = vector.extract_strided_slice %25 {offsets = [0, 0], sizes = [2, 32], strides = [1, 1]} : vector<2x128xf32> to vector<2x32xf32>
    %cst_16 = arith.constant 5.000000e-01 : f32
    %27 = vector.broadcast %cst_16 : f32 to vector<2x32xf32>
    %28 = arith.mulf %27, %26 : vector<2x32xf32>
    %cst_17 = arith.constant 5.000000e-01 : f32
    %29 = vector.broadcast %cst_17 : f32 to vector<2x32xf32>
    %30 = arith.addf %28, %29 : vector<2x32xf32>
    %31 = vector.extract_strided_slice %25 {offsets = [0, 32], sizes = [2, 32], strides = [1, 1]} : vector<2x128xf32> to vector<2x32xf32>
    %cst_18 = arith.constant 5.000000e-01 : f32
    %32 = vector.broadcast %cst_18 : f32 to vector<2x32xf32>
    %33 = arith.mulf %32, %31 : vector<2x32xf32>
    %cst_19 = arith.constant 5.000000e-01 : f32
    %34 = vector.broadcast %cst_19 : f32 to vector<2x32xf32>
    %35 = arith.addf %33, %34 : vector<2x32xf32>
    %36 = vector.extract_strided_slice %25 {offsets = [0, 64], sizes = [2, 32], strides = [1, 1]} : vector<2x128xf32> to vector<2x32xf32>
    %cst_20 = arith.constant 5.000000e-01 : f32
    %37 = vector.broadcast %cst_20 : f32 to vector<2x32xf32>
    %38 = arith.mulf %37, %36 : vector<2x32xf32>
    %cst_21 = arith.constant 5.000000e-01 : f32
    %39 = vector.broadcast %cst_21 : f32 to vector<2x32xf32>
    %40 = arith.addf %38, %39 : vector<2x32xf32>
    %41 = vector.extract_strided_slice %25 {offsets = [0, 96], sizes = [2, 32], strides = [1, 1]} : vector<2x128xf32> to vector<2x32xf32>
    %42 = arith.mulf %35, %9 : vector<2x32xf32>
    %43 = arith.mulf %30, %41 : vector<2x32xf32>
    %44 = arith.addf %42, %43 : vector<2x32xf32>
    %45 = math.tanh %44 : vector<2x32xf32>
    %46 = arith.mulf %40, %45 : vector<2x32xf32>
    %c0_22 = arith.constant 0 : index
    %c0_23 = arith.constant 0 : index
    %47 = vector.load %arg4[%c0_22, %c0_23] : memref<128x20xf32, #tpu.memory_space<vmem>>, vector<32x20xf32>
    %cst_24 = arith.constant dense<0.000000e+00> : vector<2x20xf32>
    %48 = tpu.matmul %46, %47, %cst_24 {dimension_numbers = #tpu.dot_dimension_numbers<[1], [0], [0], [1], [0, 0, 1, 1], [], []>} : vector<2x32xf32>, vector<32x20xf32>, vector<2x20xf32> -> vector<2x20xf32>
    %49 = arith.addf %21, %48 : vector<2x20xf32>
    %c2 = arith.constant 2 : index
    %c0_25 = arith.constant 0 : index
    %50 = vector.load %arg8[%c2, %c0_25] : memref<16x128xf32, #tpu.memory_space<vmem>>, vector<2x128xf32>
    %cst_26 = arith.constant dense<0.000000e+00> : vector<2x128xf32>
    %51 = tpu.matmul %46, %7, %cst_26 {dimension_numbers = #tpu.dot_dimension_numbers<[1], [0], [0], [1], [0, 0, 1, 1], [], []>} : vector<2x32xf32>, vector<32x128xf32>, vector<2x128xf32> -> vector<2x128xf32>
    %52 = arith.addf %50, %51 : vector<2x128xf32>
    %53 = math.tanh %52 : vector<2x128xf32>
    %54 = vector.extract_strided_slice %53 {offsets = [0, 0], sizes = [2, 32], strides = [1, 1]} : vector<2x128xf32> to vector<2x32xf32>
    %cst_27 = arith.constant 5.000000e-01 : f32
    %55 = vector.broadcast %cst_27 : f32 to vector<2x32xf32>
    %56 = arith.mulf %55, %54 : vector<2x32xf32>
    %cst_28 = arith.constant 5.000000e-01 : f32
    %57 = vector.broadcast %cst_28 : f32 to vector<2x32xf32>
    %58 = arith.addf %56, %57 : vector<2x32xf32>
    %59 = vector.extract_strided_slice %53 {offsets = [0, 32], sizes = [2, 32], strides = [1, 1]} : vector<2x128xf32> to vector<2x32xf32>
    %cst_29 = arith.constant 5.000000e-01 : f32
    %60 = vector.broadcast %cst_29 : f32 to vector<2x32xf32>
    %61 = arith.mulf %60, %59 : vector<2x32xf32>
    %cst_30 = arith.constant 5.000000e-01 : f32
    %62 = vector.broadcast %cst_30 : f32 to vector<2x32xf32>
    %63 = arith.addf %61, %62 : vector<2x32xf32>
    %64 = vector.extract_strided_slice %53 {offsets = [0, 64], sizes = [2, 32], strides = [1, 1]} : vector<2x128xf32> to vector<2x32xf32>
    %cst_31 = arith.constant 5.000000e-01 : f32
    %65 = vector.broadcast %cst_31 : f32 to vector<2x32xf32>
    %66 = arith.mulf %65, %64 : vector<2x32xf32>
    %cst_32 = arith.constant 5.000000e-01 : f32
    %67 = vector.broadcast %cst_32 : f32 to vector<2x32xf32>
    %68 = arith.addf %66, %67 : vector<2x32xf32>
    %69 = vector.extract_strided_slice %53 {offsets = [0, 96], sizes = [2, 32], strides = [1, 1]} : vector<2x128xf32> to vector<2x32xf32>
    %70 = arith.mulf %63, %44 : vector<2x32xf32>
    %71 = arith.mulf %58, %69 : vector<2x32xf32>
    %72 = arith.addf %70, %71 : vector<2x32xf32>
    %73 = math.tanh %72 : vector<2x32xf32>
    %74 = arith.mulf %68, %73 : vector<2x32xf32>
    %c32 = arith.constant 32 : index
    %c0_33 = arith.constant 0 : index
    %75 = vector.load %arg4[%c32, %c0_33] : memref<128x20xf32, #tpu.memory_space<vmem>>, vector<32x20xf32>
    %cst_34 = arith.constant dense<0.000000e+00> : vector<2x20xf32>
    %76 = tpu.matmul %74, %75, %cst_34 {dimension_numbers = #tpu.dot_dimension_numbers<[1], [0], [0], [1], [0, 0, 1, 1], [], []>} : vector<2x32xf32>, vector<32x20xf32>, vector<2x20xf32> -> vector<2x20xf32>
    %77 = arith.addf %49, %76 : vector<2x20xf32>
    %c4 = arith.constant 4 : index
    %c0_35 = arith.constant 0 : index
    %78 = vector.load %arg8[%c4, %c0_35] : memref<16x128xf32, #tpu.memory_space<vmem>>, vector<2x128xf32>
    %cst_36 = arith.constant dense<0.000000e+00> : vector<2x128xf32>
    %79 = tpu.matmul %74, %7, %cst_36 {dimension_numbers = #tpu.dot_dimension_numbers<[1], [0], [0], [1], [0, 0, 1, 1], [], []>} : vector<2x32xf32>, vector<32x128xf32>, vector<2x128xf32> -> vector<2x128xf32>
    %80 = arith.addf %78, %79 : vector<2x128xf32>
    %81 = math.tanh %80 : vector<2x128xf32>
    %82 = vector.extract_strided_slice %81 {offsets = [0, 0], sizes = [2, 32], strides = [1, 1]} : vector<2x128xf32> to vector<2x32xf32>
    %cst_37 = arith.constant 5.000000e-01 : f32
    %83 = vector.broadcast %cst_37 : f32 to vector<2x32xf32>
    %84 = arith.mulf %83, %82 : vector<2x32xf32>
    %cst_38 = arith.constant 5.000000e-01 : f32
    %85 = vector.broadcast %cst_38 : f32 to vector<2x32xf32>
    %86 = arith.addf %84, %85 : vector<2x32xf32>
    %87 = vector.extract_strided_slice %81 {offsets = [0, 32], sizes = [2, 32], strides = [1, 1]} : vector<2x128xf32> to vector<2x32xf32>
    %cst_39 = arith.constant 5.000000e-01 : f32
    %88 = vector.broadcast %cst_39 : f32 to vector<2x32xf32>
    %89 = arith.mulf %88, %87 : vector<2x32xf32>
    %cst_40 = arith.constant 5.000000e-01 : f32
    %90 = vector.broadcast %cst_40 : f32 to vector<2x32xf32>
    %91 = arith.addf %89, %90 : vector<2x32xf32>
    %92 = vector.extract_strided_slice %81 {offsets = [0, 64], sizes = [2, 32], strides = [1, 1]} : vector<2x128xf32> to vector<2x32xf32>
    %cst_41 = arith.constant 5.000000e-01 : f32
    %93 = vector.broadcast %cst_41 : f32 to vector<2x32xf32>
    %94 = arith.mulf %93, %92 : vector<2x32xf32>
    %cst_42 = arith.constant 5.000000e-01 : f32
    %95 = vector.broadcast %cst_42 : f32 to vector<2x32xf32>
    %96 = arith.addf %94, %95 : vector<2x32xf32>
    %97 = vector.extract_strided_slice %81 {offsets = [0, 96], sizes = [2, 32], strides = [1, 1]} : vector<2x128xf32> to vector<2x32xf32>
    %98 = arith.mulf %91, %72 : vector<2x32xf32>
    %99 = arith.mulf %86, %97 : vector<2x32xf32>
    %100 = arith.addf %98, %99 : vector<2x32xf32>
    %101 = math.tanh %100 : vector<2x32xf32>
    %102 = arith.mulf %96, %101 : vector<2x32xf32>
    %c64 = arith.constant 64 : index
    %c0_43 = arith.constant 0 : index
    %103 = vector.load %arg4[%c64, %c0_43] : memref<128x20xf32, #tpu.memory_space<vmem>>, vector<32x20xf32>
    %cst_44 = arith.constant dense<0.000000e+00> : vector<2x20xf32>
    %104 = tpu.matmul %102, %103, %cst_44 {dimension_numbers = #tpu.dot_dimension_numbers<[1], [0], [0], [1], [0, 0, 1, 1], [], []>} : vector<2x32xf32>, vector<32x20xf32>, vector<2x20xf32> -> vector<2x20xf32>
    %105 = arith.addf %77, %104 : vector<2x20xf32>
    %c6 = arith.constant 6 : index
    %c0_45 = arith.constant 0 : index
    %106 = vector.load %arg8[%c6, %c0_45] : memref<16x128xf32, #tpu.memory_space<vmem>>, vector<2x128xf32>
    %cst_46 = arith.constant dense<0.000000e+00> : vector<2x128xf32>
    %107 = tpu.matmul %102, %7, %cst_46 {dimension_numbers = #tpu.dot_dimension_numbers<[1], [0], [0], [1], [0, 0, 1, 1], [], []>} : vector<2x32xf32>, vector<32x128xf32>, vector<2x128xf32> -> vector<2x128xf32>
    %108 = arith.addf %106, %107 : vector<2x128xf32>
    %109 = math.tanh %108 : vector<2x128xf32>
    %110 = vector.extract_strided_slice %109 {offsets = [0, 0], sizes = [2, 32], strides = [1, 1]} : vector<2x128xf32> to vector<2x32xf32>
    %cst_47 = arith.constant 5.000000e-01 : f32
    %111 = vector.broadcast %cst_47 : f32 to vector<2x32xf32>
    %112 = arith.mulf %111, %110 : vector<2x32xf32>
    %cst_48 = arith.constant 5.000000e-01 : f32
    %113 = vector.broadcast %cst_48 : f32 to vector<2x32xf32>
    %114 = arith.addf %112, %113 : vector<2x32xf32>
    %115 = vector.extract_strided_slice %109 {offsets = [0, 32], sizes = [2, 32], strides = [1, 1]} : vector<2x128xf32> to vector<2x32xf32>
    %cst_49 = arith.constant 5.000000e-01 : f32
    %116 = vector.broadcast %cst_49 : f32 to vector<2x32xf32>
    %117 = arith.mulf %116, %115 : vector<2x32xf32>
    %cst_50 = arith.constant 5.000000e-01 : f32
    %118 = vector.broadcast %cst_50 : f32 to vector<2x32xf32>
    %119 = arith.addf %117, %118 : vector<2x32xf32>
    %120 = vector.extract_strided_slice %109 {offsets = [0, 64], sizes = [2, 32], strides = [1, 1]} : vector<2x128xf32> to vector<2x32xf32>
    %cst_51 = arith.constant 5.000000e-01 : f32
    %121 = vector.broadcast %cst_51 : f32 to vector<2x32xf32>
    %122 = arith.mulf %121, %120 : vector<2x32xf32>
    %cst_52 = arith.constant 5.000000e-01 : f32
    %123 = vector.broadcast %cst_52 : f32 to vector<2x32xf32>
    %124 = arith.addf %122, %123 : vector<2x32xf32>
    %125 = vector.extract_strided_slice %109 {offsets = [0, 96], sizes = [2, 32], strides = [1, 1]} : vector<2x128xf32> to vector<2x32xf32>
    %126 = arith.mulf %119, %100 : vector<2x32xf32>
    %127 = arith.mulf %114, %125 : vector<2x32xf32>
    %128 = arith.addf %126, %127 : vector<2x32xf32>
    %129 = math.tanh %128 : vector<2x32xf32>
    %130 = arith.mulf %124, %129 : vector<2x32xf32>
    %c96 = arith.constant 96 : index
    %c0_53 = arith.constant 0 : index
    %131 = vector.load %arg4[%c96, %c0_53] : memref<128x20xf32, #tpu.memory_space<vmem>>, vector<32x20xf32>
    %cst_54 = arith.constant dense<0.000000e+00> : vector<2x20xf32>
    %132 = tpu.matmul %130, %131, %cst_54 {dimension_numbers = #tpu.dot_dimension_numbers<[1], [0], [0], [1], [0, 0, 1, 1], [], []>} : vector<2x32xf32>, vector<32x20xf32>, vector<2x20xf32> -> vector<2x20xf32>
    %133 = arith.addf %105, %132 : vector<2x20xf32>
    %cst_55 = arith.constant 0.000000e+00 : f32
    %134 = vector.broadcast %cst_55 : f32 to vector<2x20xf32>
    %135 = arith.select %20, %133, %134 : vector<2x20xi1>, vector<2x20xf32>
    %cst_56 = arith.constant dense<0.000000e+00> : vector<20xf32>
    %136 = vector.multi_reduction <add>, %135, %cst_56 [0] : vector<2x20xf32> to vector<20xf32>
    %137 = vector.shape_cast %136 : vector<20xf32> to vector<1x20xf32>
    %c0_i32 = arith.constant 0 : i32
    %138 = vector.broadcast %c0_i32 : i32 to vector<2x20xi32>
    %139 = arith.cmpi eq, %11, %138 : vector<2x20xi32>
    %cst_57 = arith.constant 0.000000e+00 : f32
    %140 = vector.shape_cast %137 : vector<1x20xf32> to vector<1x20xf32>
    %141 = vector.broadcast %140 : vector<1x20xf32> to vector<2x20xf32>
    %142 = vector.broadcast %cst_57 : f32 to vector<2x20xf32>
    %143 = arith.select %139, %141, %142 : vector<2x20xi1>, vector<2x20xf32>
    %144 = arith.addf %21, %143 : vector<2x20xf32>
    %c8 = arith.constant 8 : index
    %c0_58 = arith.constant 0 : index
    %145 = vector.load %arg8[%c8, %c0_58] : memref<16x128xf32, #tpu.memory_space<vmem>>, vector<2x128xf32>
    %cst_59 = arith.constant dense<0.000000e+00> : vector<2x128xf32>
    %146 = tpu.matmul %130, %7, %cst_59 {dimension_numbers = #tpu.dot_dimension_numbers<[1], [0], [0], [1], [0, 0, 1, 1], [], []>} : vector<2x32xf32>, vector<32x128xf32>, vector<2x128xf32> -> vector<2x128xf32>
    %147 = arith.addf %145, %146 : vector<2x128xf32>
    %148 = math.tanh %147 : vector<2x128xf32>
    %149 = vector.extract_strided_slice %148 {offsets = [0, 0], sizes = [2, 32], strides = [1, 1]} : vector<2x128xf32> to vector<2x32xf32>
    %cst_60 = arith.constant 5.000000e-01 : f32
    %150 = vector.broadcast %cst_60 : f32 to vector<2x32xf32>
    %151 = arith.mulf %150, %149 : vector<2x32xf32>
    %cst_61 = arith.constant 5.000000e-01 : f32
    %152 = vector.broadcast %cst_61 : f32 to vector<2x32xf32>
    %153 = arith.addf %151, %152 : vector<2x32xf32>
    %154 = vector.extract_strided_slice %148 {offsets = [0, 32], sizes = [2, 32], strides = [1, 1]} : vector<2x128xf32> to vector<2x32xf32>
    %cst_62 = arith.constant 5.000000e-01 : f32
    %155 = vector.broadcast %cst_62 : f32 to vector<2x32xf32>
    %156 = arith.mulf %155, %154 : vector<2x32xf32>
    %cst_63 = arith.constant 5.000000e-01 : f32
    %157 = vector.broadcast %cst_63 : f32 to vector<2x32xf32>
    %158 = arith.addf %156, %157 : vector<2x32xf32>
    %159 = vector.extract_strided_slice %148 {offsets = [0, 64], sizes = [2, 32], strides = [1, 1]} : vector<2x128xf32> to vector<2x32xf32>
    %cst_64 = arith.constant 5.000000e-01 : f32
    %160 = vector.broadcast %cst_64 : f32 to vector<2x32xf32>
    %161 = arith.mulf %160, %159 : vector<2x32xf32>
    %cst_65 = arith.constant 5.000000e-01 : f32
    %162 = vector.broadcast %cst_65 : f32 to vector<2x32xf32>
    %163 = arith.addf %161, %162 : vector<2x32xf32>
    %164 = vector.extract_strided_slice %148 {offsets = [0, 96], sizes = [2, 32], strides = [1, 1]} : vector<2x128xf32> to vector<2x32xf32>
    %165 = arith.mulf %158, %128 : vector<2x32xf32>
    %166 = arith.mulf %153, %164 : vector<2x32xf32>
    %167 = arith.addf %165, %166 : vector<2x32xf32>
    %168 = math.tanh %167 : vector<2x32xf32>
    %169 = arith.mulf %163, %168 : vector<2x32xf32>
    %c0_66 = arith.constant 0 : index
    %c0_67 = arith.constant 0 : index
    %170 = vector.load %arg4[%c0_66, %c0_67] : memref<128x20xf32, #tpu.memory_space<vmem>>, vector<32x20xf32>
    %cst_68 = arith.constant dense<0.000000e+00> : vector<2x20xf32>
    %171 = tpu.matmul %169, %170, %cst_68 {dimension_numbers = #tpu.dot_dimension_numbers<[1], [0], [0], [1], [0, 0, 1, 1], [], []>} : vector<2x32xf32>, vector<32x20xf32>, vector<2x20xf32> -> vector<2x20xf32>
    %172 = arith.addf %21, %171 : vector<2x20xf32>
    %c10 = arith.constant 10 : index
    %c0_69 = arith.constant 0 : index
    %173 = vector.load %arg8[%c10, %c0_69] : memref<16x128xf32, #tpu.memory_space<vmem>>, vector<2x128xf32>
    %cst_70 = arith.constant dense<0.000000e+00> : vector<2x128xf32>
    %174 = tpu.matmul %169, %7, %cst_70 {dimension_numbers = #tpu.dot_dimension_numbers<[1], [0], [0], [1], [0, 0, 1, 1], [], []>} : vector<2x32xf32>, vector<32x128xf32>, vector<2x128xf32> -> vector<2x128xf32>
    %175 = arith.addf %173, %174 : vector<2x128xf32>
    %176 = math.tanh %175 : vector<2x128xf32>
    %177 = vector.extract_strided_slice %176 {offsets = [0, 0], sizes = [2, 32], strides = [1, 1]} : vector<2x128xf32> to vector<2x32xf32>
    %cst_71 = arith.constant 5.000000e-01 : f32
    %178 = vector.broadcast %cst_71 : f32 to vector<2x32xf32>
    %179 = arith.mulf %178, %177 : vector<2x32xf32>
    %cst_72 = arith.constant 5.000000e-01 : f32
    %180 = vector.broadcast %cst_72 : f32 to vector<2x32xf32>
    %181 = arith.addf %179, %180 : vector<2x32xf32>
    %182 = vector.extract_strided_slice %176 {offsets = [0, 32], sizes = [2, 32], strides = [1, 1]} : vector<2x128xf32> to vector<2x32xf32>
    %cst_73 = arith.constant 5.000000e-01 : f32
    %183 = vector.broadcast %cst_73 : f32 to vector<2x32xf32>
    %184 = arith.mulf %183, %182 : vector<2x32xf32>
    %cst_74 = arith.constant 5.000000e-01 : f32
    %185 = vector.broadcast %cst_74 : f32 to vector<2x32xf32>
    %186 = arith.addf %184, %185 : vector<2x32xf32>
    %187 = vector.extract_strided_slice %176 {offsets = [0, 64], sizes = [2, 32], strides = [1, 1]} : vector<2x128xf32> to vector<2x32xf32>
    %cst_75 = arith.constant 5.000000e-01 : f32
    %188 = vector.broadcast %cst_75 : f32 to vector<2x32xf32>
    %189 = arith.mulf %188, %187 : vector<2x32xf32>
    %cst_76 = arith.constant 5.000000e-01 : f32
    %190 = vector.broadcast %cst_76 : f32 to vector<2x32xf32>
    %191 = arith.addf %189, %190 : vector<2x32xf32>
    %192 = vector.extract_strided_slice %176 {offsets = [0, 96], sizes = [2, 32], strides = [1, 1]} : vector<2x128xf32> to vector<2x32xf32>
    %193 = arith.mulf %186, %167 : vector<2x32xf32>
    %194 = arith.mulf %181, %192 : vector<2x32xf32>
    %195 = arith.addf %193, %194 : vector<2x32xf32>
    %196 = math.tanh %195 : vector<2x32xf32>
    %197 = arith.mulf %191, %196 : vector<2x32xf32>
    %c32_77 = arith.constant 32 : index
    %c0_78 = arith.constant 0 : index
    %198 = vector.load %arg4[%c32_77, %c0_78] : memref<128x20xf32, #tpu.memory_space<vmem>>, vector<32x20xf32>
    %cst_79 = arith.constant dense<0.000000e+00> : vector<2x20xf32>
    %199 = tpu.matmul %197, %198, %cst_79 {dimension_numbers = #tpu.dot_dimension_numbers<[1], [0], [0], [1], [0, 0, 1, 1], [], []>} : vector<2x32xf32>, vector<32x20xf32>, vector<2x20xf32> -> vector<2x20xf32>
    %200 = arith.addf %172, %199 : vector<2x20xf32>
    %c12 = arith.constant 12 : index
    %c0_80 = arith.constant 0 : index
    %201 = vector.load %arg8[%c12, %c0_80] : memref<16x128xf32, #tpu.memory_space<vmem>>, vector<2x128xf32>
    %cst_81 = arith.constant dense<0.000000e+00> : vector<2x128xf32>
    %202 = tpu.matmul %197, %7, %cst_81 {dimension_numbers = #tpu.dot_dimension_numbers<[1], [0], [0], [1], [0, 0, 1, 1], [], []>} : vector<2x32xf32>, vector<32x128xf32>, vector<2x128xf32> -> vector<2x128xf32>
    %203 = arith.addf %201, %202 : vector<2x128xf32>
    %204 = math.tanh %203 : vector<2x128xf32>
    %205 = vector.extract_strided_slice %204 {offsets = [0, 0], sizes = [2, 32], strides = [1, 1]} : vector<2x128xf32> to vector<2x32xf32>
    %cst_82 = arith.constant 5.000000e-01 : f32
    %206 = vector.broadcast %cst_82 : f32 to vector<2x32xf32>
    %207 = arith.mulf %206, %205 : vector<2x32xf32>
    %cst_83 = arith.constant 5.000000e-01 : f32
    %208 = vector.broadcast %cst_83 : f32 to vector<2x32xf32>
    %209 = arith.addf %207, %208 : vector<2x32xf32>
    %210 = vector.extract_strided_slice %204 {offsets = [0, 32], sizes = [2, 32], strides = [1, 1]} : vector<2x128xf32> to vector<2x32xf32>
    %cst_84 = arith.constant 5.000000e-01 : f32
    %211 = vector.broadcast %cst_84 : f32 to vector<2x32xf32>
    %212 = arith.mulf %211, %210 : vector<2x32xf32>
    %cst_85 = arith.constant 5.000000e-01 : f32
    %213 = vector.broadcast %cst_85 : f32 to vector<2x32xf32>
    %214 = arith.addf %212, %213 : vector<2x32xf32>
    %215 = vector.extract_strided_slice %204 {offsets = [0, 64], sizes = [2, 32], strides = [1, 1]} : vector<2x128xf32> to vector<2x32xf32>
    %cst_86 = arith.constant 5.000000e-01 : f32
    %216 = vector.broadcast %cst_86 : f32 to vector<2x32xf32>
    %217 = arith.mulf %216, %215 : vector<2x32xf32>
    %cst_87 = arith.constant 5.000000e-01 : f32
    %218 = vector.broadcast %cst_87 : f32 to vector<2x32xf32>
    %219 = arith.addf %217, %218 : vector<2x32xf32>
    %220 = vector.extract_strided_slice %204 {offsets = [0, 96], sizes = [2, 32], strides = [1, 1]} : vector<2x128xf32> to vector<2x32xf32>
    %221 = arith.mulf %214, %195 : vector<2x32xf32>
    %222 = arith.mulf %209, %220 : vector<2x32xf32>
    %223 = arith.addf %221, %222 : vector<2x32xf32>
    %224 = math.tanh %223 : vector<2x32xf32>
    %225 = arith.mulf %219, %224 : vector<2x32xf32>
    %c64_88 = arith.constant 64 : index
    %c0_89 = arith.constant 0 : index
    %226 = vector.load %arg4[%c64_88, %c0_89] : memref<128x20xf32, #tpu.memory_space<vmem>>, vector<32x20xf32>
    %cst_90 = arith.constant dense<0.000000e+00> : vector<2x20xf32>
    %227 = tpu.matmul %225, %226, %cst_90 {dimension_numbers = #tpu.dot_dimension_numbers<[1], [0], [0], [1], [0, 0, 1, 1], [], []>} : vector<2x32xf32>, vector<32x20xf32>, vector<2x20xf32> -> vector<2x20xf32>
    %228 = arith.addf %200, %227 : vector<2x20xf32>
    %c14 = arith.constant 14 : index
    %c0_91 = arith.constant 0 : index
    %229 = vector.load %arg8[%c14, %c0_91] : memref<16x128xf32, #tpu.memory_space<vmem>>, vector<2x128xf32>
    %cst_92 = arith.constant dense<0.000000e+00> : vector<2x128xf32>
    %230 = tpu.matmul %225, %7, %cst_92 {dimension_numbers = #tpu.dot_dimension_numbers<[1], [0], [0], [1], [0, 0, 1, 1], [], []>} : vector<2x32xf32>, vector<32x128xf32>, vector<2x128xf32> -> vector<2x128xf32>
    %231 = arith.addf %229, %230 : vector<2x128xf32>
    %232 = math.tanh %231 : vector<2x128xf32>
    %233 = vector.extract_strided_slice %232 {offsets = [0, 0], sizes = [2, 32], strides = [1, 1]} : vector<2x128xf32> to vector<2x32xf32>
    %cst_93 = arith.constant 5.000000e-01 : f32
    %234 = vector.broadcast %cst_93 : f32 to vector<2x32xf32>
    %235 = arith.mulf %234, %233 : vector<2x32xf32>
    %cst_94 = arith.constant 5.000000e-01 : f32
    %236 = vector.broadcast %cst_94 : f32 to vector<2x32xf32>
    %237 = arith.addf %235, %236 : vector<2x32xf32>
    %238 = vector.extract_strided_slice %232 {offsets = [0, 32], sizes = [2, 32], strides = [1, 1]} : vector<2x128xf32> to vector<2x32xf32>
    %cst_95 = arith.constant 5.000000e-01 : f32
    %239 = vector.broadcast %cst_95 : f32 to vector<2x32xf32>
    %240 = arith.mulf %239, %238 : vector<2x32xf32>
    %cst_96 = arith.constant 5.000000e-01 : f32
    %241 = vector.broadcast %cst_96 : f32 to vector<2x32xf32>
    %242 = arith.addf %240, %241 : vector<2x32xf32>
    %243 = vector.extract_strided_slice %232 {offsets = [0, 64], sizes = [2, 32], strides = [1, 1]} : vector<2x128xf32> to vector<2x32xf32>
    %cst_97 = arith.constant 5.000000e-01 : f32
    %244 = vector.broadcast %cst_97 : f32 to vector<2x32xf32>
    %245 = arith.mulf %244, %243 : vector<2x32xf32>
    %cst_98 = arith.constant 5.000000e-01 : f32
    %246 = vector.broadcast %cst_98 : f32 to vector<2x32xf32>
    %247 = arith.addf %245, %246 : vector<2x32xf32>
    %248 = vector.extract_strided_slice %232 {offsets = [0, 96], sizes = [2, 32], strides = [1, 1]} : vector<2x128xf32> to vector<2x32xf32>
    %249 = arith.mulf %242, %223 : vector<2x32xf32>
    %250 = arith.mulf %237, %248 : vector<2x32xf32>
    %251 = arith.addf %249, %250 : vector<2x32xf32>
    %252 = math.tanh %251 : vector<2x32xf32>
    %253 = arith.mulf %247, %252 : vector<2x32xf32>
    %c96_99 = arith.constant 96 : index
    %c0_100 = arith.constant 0 : index
    %254 = vector.load %arg4[%c96_99, %c0_100] : memref<128x20xf32, #tpu.memory_space<vmem>>, vector<32x20xf32>
    %cst_101 = arith.constant dense<0.000000e+00> : vector<2x20xf32>
    %255 = tpu.matmul %253, %254, %cst_101 {dimension_numbers = #tpu.dot_dimension_numbers<[1], [0], [0], [1], [0, 0, 1, 1], [], []>} : vector<2x32xf32>, vector<32x20xf32>, vector<2x20xf32> -> vector<2x20xf32>
    %256 = arith.addf %228, %255 : vector<2x20xf32>
    %cst_102 = arith.constant 0.000000e+00 : f32
    %257 = vector.broadcast %cst_102 : f32 to vector<2x20xf32>
    %258 = arith.select %20, %256, %257 : vector<2x20xi1>, vector<2x20xf32>
    %cst_103 = arith.constant dense<0.000000e+00> : vector<20xf32>
    %259 = vector.multi_reduction <add>, %258, %cst_103 [0] : vector<2x20xf32> to vector<20xf32>
    %260 = vector.shape_cast %259 : vector<20xf32> to vector<1x20xf32>
    %c1_i32_104 = arith.constant 1 : i32
    %261 = vector.broadcast %c1_i32_104 : i32 to vector<2x20xi32>
    %262 = arith.cmpi eq, %11, %261 : vector<2x20xi32>
    %cst_105 = arith.constant 0.000000e+00 : f32
    %263 = vector.shape_cast %260 : vector<1x20xf32> to vector<1x20xf32>
    %264 = vector.broadcast %263 : vector<1x20xf32> to vector<2x20xf32>
    %265 = vector.broadcast %cst_105 : f32 to vector<2x20xf32>
    %266 = arith.select %262, %264, %265 : vector<2x20xi1>, vector<2x20xf32>
    %267 = arith.addf %144, %266 : vector<2x20xf32>
    %c0_106 = arith.constant 0 : index
    %c0_107 = arith.constant 0 : index
    %268 = vector.load %arg5[%c0_106, %c0_107] : memref<20x10xf32, #tpu.memory_space<vmem>>, vector<20x10xf32>
    %cst_108 = arith.constant dense<0.000000e+00> : vector<2x10xf32>
    %269 = tpu.matmul %267, %268, %cst_108 {dimension_numbers = #tpu.dot_dimension_numbers<[1], [0], [0], [1], [0, 0, 1, 1], [], []>} : vector<2x20xf32>, vector<20x10xf32>, vector<2x10xf32> -> vector<2x10xf32>
    %c0_109 = arith.constant 0 : index
    %c0_110 = arith.constant 0 : index
    %270 = vector.load %arg6[%c0_109, %c0_110] : memref<1x10xf32, #tpu.memory_space<vmem>>, vector<1x10xf32>
    %271 = vector.broadcast %270 : vector<1x10xf32> to vector<2x10xf32>
    %272 = arith.addf %269, %271 : vector<2x10xf32>
    %cst_111 = arith.constant dense<0xFF800000> : vector<2xf32>
    %273 = vector.multi_reduction <maximumf>, %272, %cst_111 [1] : vector<2x10xf32> to vector<2xf32>
    %274 = vector.shape_cast %273 : vector<2xf32> to vector<2x1xf32>
    %275 = vector.broadcast %274 : vector<2x1xf32> to vector<2x10xf32>
    %276 = arith.subf %272, %275 : vector<2x10xf32>
    %277 = math.exp %276 : vector<2x10xf32>
    %cst_112 = arith.constant dense<0.000000e+00> : vector<2xf32>
    %278 = vector.multi_reduction <add>, %277, %cst_112 [1] : vector<2x10xf32> to vector<2xf32>
    %279 = vector.shape_cast %278 : vector<2xf32> to vector<2x1xf32>
    %280 = vector.broadcast %279 : vector<2x1xf32> to vector<2x10xf32>
    %281 = arith.divf %277, %280 : vector<2x10xf32>
    %c0_113 = arith.constant 0 : index
    %c0_114 = arith.constant 0 : index
    %282 = vector.load %arg7[%c0_113, %c0_114] : memref<2x10xf32, #tpu.memory_space<vmem>>, vector<2x10xf32>
    tpu.vector_store %arg7[%c0_113, %c0_114], %281 {strides = array<i32>} : memref<2x10xf32, #tpu.memory_space<vmem>>, vector<2x10xf32>,
    return
  }
}

</mosaic_0001>

<bundles_post_ra>
// kernel: tpu_custom_call.1
= control target key start
LH: loop header
LB: loop body
LE: loop exit
PB: predicated region body
PF: predicated region fallthrough
CT: control target
= control target key end

     0   :  { %vm38_vm0 = vcmask 130048   ;;  %v2116_v4 = vmov 0.0|0.0   ;;  %vm2117_vm1 = vmmov 0   ;;  %v2118_v10 = vmov 0.0   ;;  %s2437_s0 = inlined_call_operand.vmem [shape: f32[16,16], index: 0, kind: input, shape index: {}]   ;;  %s2438_s1 = inlined_call_operand.vmem [shape: f32[16,128], index: 1, kind: input, shape index: {}]   ;;  %s2439_s2 = inlined_call_operand.vmem [shape: f32[32,128], index: 2, kind: input, shape index: {}]   ;;  %s2440_s3 = inlined_call_operand.vmem [shape: f32[1,128], index: 3, kind: input, shape index: {}]   ;;  %s2441_s4 = inlined_call_operand.vmem [shape: f32[128,20], index: 4, kind: input, shape index: {}]   ;;  %s2442_s5 = inlined_call_operand.vmem [shape: f32[20,10], index: 5, kind: input, shape index: {}]   ;;  %s2443_s6 = inlined_call_operand.vmem [shape: f32[1,10], index: 6, kind: input, shape index: {}]   ;;  %s2444_s7 = inlined_call_operand.hbm [shape: f32[2,10], index: 7, kind: output, shape index: {}]  }
   0x1   :  { %v29_v0 = vld [vmem:[%s2438_s1] sm:$0xff]  ;;  %v30_v1 = vld [vmem:[%s2438_s1 + $0x8] sm:$0xff]  ;;  %1939 = vmatprep.subr.bf16.mxu1 %v2116_v4  ;;  %v124_v8 = vld [vmem:[%s2439_s2 + $0x10] sm:$0xff]  ;;  %1758 = vmatprep.mubr.msk.f32.mxu1 %vm2117_vm1, %v2118_v10 }
   0x2   :  { %v27_v2 = vld [vmem:[%s2437_s0] sm:$0xff]  ;;  %v1935_v3 = vpack.c.bf16 %v30_v1, %v29_v0  ;;  %v123_v6 = vld [vmem:[%s2439_s2 + $0x8] sm:$0xff]  ;;  %v125_v9 = vld [vmem:[%s2439_s2 + $0x18] sm:$0xff] }
   0x3   :  { %1747 = vmatprep.mubr.msk.f32.mxu0 %vm38_vm0, %v27_v2  ;;  %v122_v5 = vld [vmem:[%s2439_s2] sm:$0xff] }
   0x4   :  { %v2179_v7 = vpack.c.bf16 %v123_v6, %v122_v5 }
   0x5   :  { %12 = vsyncpa [#allocation4], 0  ;;  %1936 = vmatprep.subr.bf16.mxu0 %v1935_v3  ;;  %v28_v11 = vld [vmem:[%s2437_s0 + $0x8] sm:$0xff]  ;;  %v2193_v12 = vpack.c.bf16 %v125_v9, %v124_v8  ;;  %v1634_v13 = vld [vmem:[%s2440_s3] ss:$0 sm:$0xff]  ;;  %s2119_s16 = smov 32  }
   0x6   :  { %1938 = vmatpush3.bf16.msra.mxu0 %v1935_v3  ;;  %1941 = vmatpush3.bf16.msra.mxu1 %v2179_v7  ;;  %s2120_s3 = smov 64   ;;  %vm137_vm2 = vcmask 261120   ;;  %v333_v46 = vld [vmem:[%s2441_s4 + $0x20] sm:$0xff]  ;;  %v334_v47 = vld [vmem:[%s2441_s4 + $0x28] sm:$0xff]  ;;  %v335_v48 = vld [vmem:[%s2441_s4 + $0x30] sm:$0xff]  ;;  %vm1533_vm3 = vcmask 1043456  }
   0x7   :  { %1942 = vmatprep.subr.bf16.mxu1 %v2116_v4  ;;  %1945 = vmatprep.subr.bf16.mxu0 %v2116_v4  ;;  %v2234_v49 = vpack.c.bf16 %v334_v47, %v333_v46  ;;  %v336_v50 = vld [vmem:[%s2441_s4 + $0x38] sm:$0xff]  ;;  %v232_v55 = vld [vmem:[%s2441_s4] sm:$0xff]  ;;  %v233_v56 = vld [vmem:[%s2441_s4 + $0x8] sm:$0xff]  ;;  %vm827_vm7 = vcmask 156672   ;;  %vm1529_vm10 = vcmask 162816   ;;  %vm1607_vm11 = vcmask 74752  }
   0x8   :  { %v2240_v51 = vpack.c.bf16 %v336_v50, %v335_v48  ;;  %v2253_v57 = vpack.c.bf16 %v233_v56, %v232_v55  ;;  %v234_v58 = vld [vmem:[%s2441_s4 + $0x10] sm:$0xff]  ;;  %v235_v59 = vld [vmem:[%s2441_s4 + $0x18] sm:$0xff]  ;;  %s2121_s28 = smov [#allocation3]  }
   0x9   :  { %1748 = vmatmul.mubr.msk.f32.vlgmr.msra.gmra.mrb[0].mxu0 %vm38_vm0, %v28_v11  ;;  %v2264_v61 = vpack.c.bf16 %v235_v59, %v234_v58  ;;  %s1626_s29 = sshll.u32 %s2121_s28, 4  ;;  %s1627_s29 = int_to_ptr.vmem [resolvable:$true] %s1626_s29 }
   0xa   :  { %1944 = vmatpush3.bf16.msra.mxu1 %v2193_v12  ;;  %1947 = vmatpush3.bf16.msra.mxu0 %v2179_v7  ;;  %p2097_p1 = scmp.lt.s32.totalorder %s1627_s29, %s1627_s29 }
   0xb   :  { %1948 = vmatprep.subr.bf16.mxu0 %v2116_v4  ;;  %1769 = vmatprep.mubr.msk.f32.mxu0 %vm2117_vm1, %v2118_v10 }
   0xc   :  { %1951 = vmatprep.subr.bf16.mxu1 %v2116_v4 }
   0xd   :  { %1759 = vmatmul.mubr.f32.vlgmr.msra.gmra.mrb[0].mxu1 %v2118_v10 }
   0xe   :  { %1950 = vmatpush3.bf16.msra.mxu0 %v2193_v12  ;;  %1780 = vmatprep.mubr.msk.f32.mxu1 %vm2117_vm1, %v2118_v10 }
   0xf   :  { %1963 = vmatprep.subr.bf16.mxu0 %v2116_v4  ;;  %1953 = vmatpush3.bf16.msra.mxu1 %v2234_v49 }
  0x10   :  { %1954 = vmatprep.subr.bf16.mxu1 %v2116_v4 }
  0x13   :  { %1956 = vmatpush3.bf16.msra.mxu1 %v2240_v51 }
  0x14   :  { %1957 = vmatprep.subr.bf16.mxu1 %v2116_v4 }
  0xdc   :  { %v1749_v14 = vpop.f32.mrb[0].mxu0 }
  0xdd   :  { %v117_v15 = vadd.f32 %v1749_v14, %v1634_v13  ;;  %v111_v16 = vpop.f32.mrb[1].mxu0  ;;  %v574_v14 = vld [vmem:[%s2441_s4 + $0x40] sm:$0xff] }
  0xde   :  { %v112_v17 = vadd.f32 %v1634_v13, %v111_v16  ;;  %v576_v16 = vld [vmem:[%s2441_s4 + $0x50] sm:$0xff] }
  0xdf   :  { %121 = vst [vmem:[#allocation2 + $0x8] sm:$0xff] %v117_v15  ;;  %v575_v15 = vld [vmem:[%s2441_s4 + $0x48] sm:$0xff] }
  0xe0   :  { %120 = vst [vmem:[#allocation2] sm:$0xff] %v112_v17  ;;  %v207_v18 = vpop.f32.mrb[0].mxu1  ;;  %v2291_v17 = vpack.c.bf16 %v575_v15, %v574_v14 }
  0xe1   :  { %v1760_v19 = vpop.f32.mrb[1].mxu1 }
  0xe6   :  { %v838_v47 = vld [vmem:[#allocation2 + $0x8] sm:$0x3] }
  0xe7   :  { %v136_v20 = vld [vmem:[#allocation2] sm:$0x3]  ;;  %v236_v34 = vld [vmem:[#allocation2 + $0x2] sm:$0x3]  ;;  %v482_v62 = vld [vmem:[#allocation2 + $0x4] sm:$0x3] }
  0xe8   :  { %v211_v21 = vadd.f32 %v207_v18, %v136_v20  ;;  %v577_v18 = vld [vmem:[%s2441_s4 + $0x58] sm:$0xff] }
  0xe9   :  { %v2297_v19 = vpack.c.bf16 %v577_v18, %v576_v16 }
  0xea   :  { %2056 = vtanh.f32 %v211_v21 }
  0xf4   :  { %v2057_v22 = vpop.eup %2056 }
  0xf5   :  { %217 = vrot.lane.b32.xlu0 %v2057_v22, %s2119_s16  ;;  %v213_v23 = vmul.f32 0.5, %v2057_v22 }
  0xf7   :  { %v214_v24 = vadd.f32 0.5, %v213_v23 }
  0xf9   :  { %v215_v27 = vmul.f32 0.0, %v214_v24 }
 0x167   :  { %v218_v25 = vpop.permute.xlu0 %217 }
 0x168   :  { %v220_v26 = vmul.f32 %v218_v25, %v214_v24 }
 0x16a   :  { %222 = vrot.lane.b32.xlu0 %v220_v26, %s2119_s16 }
 0x1dc   :  { %v223_v28 = vpop.permute.xlu0 %222 }
 0x1dd   :  { %v225_v29 = vadd.f32 %v223_v28, %v215_v27 }
 0x1df   :  { %2058 = vtanh.f32 %v225_v29 }
 0x1e9   :  { %v2059_v30 = vpop.eup %2058 }
 0x1ea   :  { %228 = vrot.lane.b32.xlu1 %v2059_v30, %s2119_s16 }
 0x25c   :  { %v229_v31 = vpop.permute.xlu1 %228 }
 0x25d   :  { %v231_v32 = vmul.f32 %v229_v31, %v214_v24  ;;  %v654_v24 = vld [vmem:[#allocation2 + $0x6] sm:$0x3] }
 0x25f   :  { %238 = vrot.lane.b32.xlu1 %v231_v32, %s2120_s3 }
 0x2d1   :  { %v239_v33 = vpop.permute.xlu1 %238 }
 0x2d2   :  { %1770 = vmatmul.mubr.msk.f32.vlgmr.msra.gmra.mrb[2].mxu0 %vm137_vm2, %v239_v33 }
 0x2d3   :  { %1965 = vmatpush3.bf16.msra.mxu0 %v2179_v7  ;;  %1802 = vmatprep.mubr.msk.f32.mxu0 %vm2117_vm1, %v2118_v10 }
 0x2d4   :  { %1966 = vmatprep.subr.bf16.mxu0 %v2116_v4 }
 0x2d7   :  { %1968 = vmatpush3.bf16.msra.mxu0 %v2193_v12 }
 0x2d8   :  { %1975 = vmatprep.subr.bf16.mxu0 %v2116_v4 }
 0x3a5   :  { %v308_v35 = vpop.f32.mrb[2].mxu0 }
 0x3a6   :  { %v312_v36 = vadd.f32 %v308_v35, %v236_v34  ;;  %v1771_v37 = vpop.f32.mrb[3].mxu0 }
 0x3a7   :  { %v747_v37 = vld [vmem:[%s2441_s4 + $0x68] sm:$0xff] }
 0x3a8   :  { %2060 = vtanh.f32 %v312_v36  ;;  %v746_v36 = vld [vmem:[%s2441_s4 + $0x60] sm:$0xff] }
 0x3b2   :  { %v2061_v38 = vpop.eup %2060 }
 0x3b3   :  { %318 = vrot.lane.b32.xlu0 %v2061_v38, %s2119_s16  ;;  %v314_v39 = vmul.f32 0.5, %v2061_v38  ;;  %v748_v38 = vld [vmem:[%s2441_s4 + $0x70] sm:$0xff] }
 0x3b5   :  { %v315_v40 = vadd.f32 0.5, %v314_v39  ;;  %v2325_v39 = vpack.c.bf16 %v747_v37, %v746_v36 }
 0x3b7   :  { %v316_v43 = vmul.f32 %v315_v40, %v225_v29 }
 0x425   :  { %v319_v41 = vpop.permute.xlu0 %318 }
 0x426   :  { %v321_v42 = vmul.f32 %v319_v41, %v315_v40 }
 0x428   :  { %323 = vrot.lane.b32.xlu1 %v321_v42, %s2119_s16 }
 0x49a   :  { %v324_v44 = vpop.permute.xlu1 %323 }
 0x49b   :  { %v326_v45 = vadd.f32 %v324_v44, %v316_v43 }
 0x49d   :  { %2062 = vtanh.f32 %v326_v45 }
 0x4a7   :  { %v2063_v52 = vpop.eup %2062 }
 0x4a8   :  { %329 = vrot.lane.b32.xlu0 %v2063_v52, %s2119_s16 }
 0x51a   :  { %v330_v53 = vpop.permute.xlu0 %329 }
 0x51b   :  { %v332_v54 = vmul.f32 %v330_v53, %v315_v40  ;;  %v749_v40 = vld [vmem:[%s2441_s4 + $0x78] sm:$0xff] }
 0x51c   :  { %v2331_v41 = vpack.c.bf16 %v749_v40, %v748_v38 }
 0x51d   :  { %338 = vrot.lane.b32.xlu1 %v332_v54, %s2120_s3 }
 0x58f   :  { %v339_v60 = vpop.permute.xlu1 %338 }
 0x590   :  { %1781 = vmatmul.mubr.msk.f32.vlgmr.msra.gmra.mrb[2].mxu1 %vm137_vm2, %v339_v60  ;;  %1803 = vmatmul.mubr.msk.f32.vlgmr.msra.gmra.mrb[4].mxu0 %vm137_vm2, %v339_v60 }
 0x591   :  { %1959 = vmatpush3.bf16.msra.mxu1 %v2253_v57  ;;  %1791 = vmatprep.mubr.msk.f32.mxu1 %vm2117_vm1, %v2118_v10 }
 0x592   :  { %1960 = vmatprep.subr.bf16.mxu1 %v2116_v4  ;;  %1977 = vmatpush3.bf16.msra.mxu0 %v2179_v7 }
 0x593   :  { %1978 = vmatprep.subr.bf16.mxu0 %v2116_v4  ;;  %1824 = vmatprep.mubr.msk.f32.mxu0 %vm2117_vm1, %v2118_v10 }
 0x595   :  { %1962 = vmatpush3.bf16.msra.mxu1 %v2264_v61 }
 0x596   :  { %1969 = vmatprep.subr.bf16.mxu1 %v2116_v4  ;;  %1980 = vmatpush3.bf16.msra.mxu0 %v2193_v12 }
 0x597   :  { %1987 = vmatprep.subr.bf16.mxu0 %v2116_v4 }
 0x598   :  { %1792 = vmatmul.mubr.msk.f32.vlgmr.msra.gmra.mrb[2].mxu1 %vm137_vm2, %v239_v33 }
 0x599   :  { %1813 = vmatprep.mubr.msk.f32.mxu1 %vm2117_vm1, %v2118_v10  ;;  %1971 = vmatpush3.bf16.msra.mxu1 %v2291_v17 }
 0x59a   :  { %1972 = vmatprep.subr.bf16.mxu1 %v2116_v4 }
 0x59d   :  { %1974 = vmatpush3.bf16.msra.mxu1 %v2297_v19 }
 0x59e   :  { %1981 = vmatprep.subr.bf16.mxu1 %v2116_v4 }
 0x663   :  { %v549_v63 = vpop.f32.mrb[4].mxu0 }
 0x664   :  { %v553_v0 = vadd.f32 %v549_v63, %v482_v62  ;;  %v1804_v1 = vpop.f32.mrb[5].mxu0 }
 0x666   :  { %2064 = vtanh.f32 %v553_v0 }
 0x670   :  { %v2065_v2 = vpop.eup %2064 }
 0x671   :  { %559 = vrot.lane.b32.xlu0 %v2065_v2, %s2119_s16  ;;  %v555_v3 = vmul.f32 0.5, %v2065_v2  ;;  %v930_v2 = vld [vmem:[#allocation2 + $0xa] sm:$0x3] }
 0x673   :  { %v556_v5 = vadd.f32 0.5, %v555_v3 }
 0x675   :  { %v557_v9 = vmul.f32 %v556_v5, %v326_v45 }
 0x6e3   :  { %v560_v6 = vpop.permute.xlu0 %559 }
 0x6e4   :  { %v562_v8 = vmul.f32 %v560_v6, %v556_v5 }
 0x6e6   :  { %564 = vrot.lane.b32.xlu1 %v562_v8, %s2119_s16 }
 0x758   :  { %v565_v11 = vpop.permute.xlu1 %564 }
 0x759   :  { %v567_v13 = vadd.f32 %v565_v11, %v557_v9 }
 0x75b   :  { %2066 = vtanh.f32 %v567_v13 }
 0x765   :  { %v2067_v20 = vpop.eup %2066 }
 0x766   :  { %570 = vrot.lane.b32.xlu0 %v2067_v20, %s2119_s16 }
 0x7d8   :  { %v571_v21 = vpop.permute.xlu0 %570 }
 0x7d9   :  { %v573_v22 = vmul.f32 %v571_v21, %v556_v5 }
 0x7db   :  { %579 = vrot.lane.b32.xlu1 %v573_v22, %s2120_s3 }
 0x84d   :  { %v580_v23 = vpop.permute.xlu1 %579 }
 0x84e   :  { %1814 = vmatmul.mubr.msk.f32.vlgmr.msra.gmra.mrb[2].mxu1 %vm137_vm2, %v580_v23  ;;  %1825 = vmatmul.mubr.msk.f32.vlgmr.msra.gmra.mrb[6].mxu0 %vm137_vm2, %v580_v23 }
 0x84f   :  { %1989 = vmatpush3.bf16.msra.mxu0 %v2179_v7  ;;  %1835 = vmatprep.mubr.msk.f32.mxu1 %vm2117_vm1, %v2118_v10 }
 0x850   :  { %1990 = vmatprep.subr.bf16.mxu0 %v2116_v4  ;;  %1846 = vmatprep.mubr.msk.f32.mxu0 %vm2117_vm1, %v2118_v10 }
 0x851   :  { %1983 = vmatpush3.bf16.msra.mxu1 %v2325_v39 }
 0x852   :  { %1984 = vmatprep.subr.bf16.mxu1 %v2116_v4 }
 0x853   :  { %1992 = vmatpush3.bf16.msra.mxu0 %v2193_v12 }
 0x854   :  { %1993 = vmatprep.subr.bf16.mxu0 %v2116_v4 }
 0x855   :  { %1986 = vmatpush3.bf16.msra.mxu1 %v2331_v41 }
 0x856   :  { %1999 = vmatprep.subr.bf16.mxu1 %v2116_v4 }
 0x921   :  { %v721_v25 = vpop.f32.mrb[6].mxu0 }
 0x922   :  { %v725_v26 = vadd.f32 %v721_v25, %v654_v24  ;;  %v1826_v27 = vpop.f32.mrb[7].mxu0 }
 0x924   :  { %2068 = vtanh.f32 %v725_v26 }
 0x92e   :  { %v2069_v28 = vpop.eup %2068 }
 0x92f   :  { %731 = vrot.lane.b32.xlu0 %v2069_v28, %s2119_s16  ;;  %v727_v29 = vmul.f32 0.5, %v2069_v28 }
 0x931   :  { %v728_v30 = vadd.f32 0.5, %v727_v29 }
 0x933   :  { %v729_v33 = vmul.f32 %v728_v30, %v567_v13 }
 0x9a1   :  { %v732_v31 = vpop.permute.xlu0 %731 }
 0x9a2   :  { %v734_v32 = vmul.f32 %v732_v31, %v728_v30 }
 0x9a4   :  { %736 = vrot.lane.b32.xlu1 %v734_v32, %s2119_s16 }
 0xa16   :  { %v737_v34 = vpop.permute.xlu1 %736 }
 0xa17   :  { %v739_v35 = vadd.f32 %v737_v34, %v729_v33  ;;  %v1340_v34 = vld [vmem:[#allocation2 + $0xe] sm:$0x3] }
 0xa19   :  { %2070 = vtanh.f32 %v739_v35 }
 0xa23   :  { %v2071_v42 = vpop.eup %2070 }
 0xa24   :  { %742 = vrot.lane.b32.xlu0 %v2071_v42, %s2119_s16 }
 0xa96   :  { %v743_v43 = vpop.permute.xlu0 %742 }
 0xa97   :  { %v745_v44 = vmul.f32 %v743_v43, %v728_v30 }
 0xa99   :  { %751 = vrot.lane.b32.xlu1 %v745_v44, %s2120_s3 }
 0xb0b   :  { %v752_v45 = vpop.permute.xlu1 %751 }
 0xb0c   :  { %1836 = vmatmul.mubr.msk.f32.vlgmr.msra.gmra.mrb[2].mxu1 %vm137_vm2, %v752_v45  ;;  %1847 = vmatmul.mubr.msk.f32.vlgmr.msra.gmra.mrb[8].mxu0 %vm137_vm2, %v752_v45 }
 0xb0d   :  { %1995 = vmatpush3.bf16.msra.mxu0 %v2179_v7  ;;  %1857 = vmatprep.mubr.msk.f32.mxu0 %vm2117_vm1, %v2118_v10 }
 0xb0e   :  { %1996 = vmatprep.subr.bf16.mxu0 %v2116_v4  ;;  %2001 = vmatpush3.bf16.msra.mxu1 %v2234_v49 }
 0xb0f   :  { %2002 = vmatprep.subr.bf16.mxu1 %v2116_v4  ;;  %1868 = vmatprep.mubr.msk.f32.mxu1 %vm2117_vm1, %v2118_v10 }
 0xb11   :  { %1998 = vmatpush3.bf16.msra.mxu0 %v2193_v12 }
 0xb12   :  { %2011 = vmatprep.subr.bf16.mxu0 %v2116_v4  ;;  %2004 = vmatpush3.bf16.msra.mxu1 %v2240_v51 }
 0xb13   :  { %2005 = vmatprep.subr.bf16.mxu1 %v2116_v4 }
 0xbdf   :  { %v2352_v46 = vpop.f32.mrb[2].mxu1  ;;  %v905_v48 = vpop.f32.mrb[8].mxu0 }
 0xbe0   :  { %v909_v50 = vadd.f32 %v905_v48, %v838_v47  ;;  %v1837_v52 = vpop.f32.mrb[3].mxu1  ;;  %v1848_v49 = vpop.f32.mrb[9].mxu0 }
 0xbe1   :  { %v1519_v52 = vld [vmem:[%s2442_s5] sm:$0xff]  ;;  %v1520_v49 = vld [vmem:[%s2442_s5 + $0x8] sm:$0xff] }
 0xbe2   :  { %2072 = vtanh.f32 %v909_v50 }
 0xbec   :  { %v2073_v53 = vpop.eup %2072 }
 0xbed   :  { %915 = vrot.lane.b32.xlu0 %v2073_v53, %s2119_s16  ;;  %v911_v54 = vmul.f32 0.5, %v2073_v53  ;;  %v2036_v53 = vpack.c.bf16 %v1520_v49, %v1519_v52 }
 0xbef   :  { %v912_v55 = vadd.f32 0.5, %v911_v54  ;;  %v1521_v54 = vld [vmem:[%s2442_s5 + $0x10] sm:$0xf] }
 0xbf1   :  { %v913_v51 = vmul.f32 %v912_v55, %v739_v35 }
 0xc5f   :  { %v916_v56 = vpop.permute.xlu0 %915 }
 0xc60   :  { %v918_v58 = vmul.f32 %v916_v56, %v912_v55 }
 0xc62   :  { %920 = vrot.lane.b32.xlu1 %v918_v58, %s2119_s16 }
 0xcd4   :  { %v921_v59 = vpop.permute.xlu1 %920 }
 0xcd5   :  { %v923_v60 = vadd.f32 %v921_v59, %v913_v51 }
 0xcd7   :  { %2074 = vtanh.f32 %v923_v60 }
 0xce1   :  { %v2075_v62 = vpop.eup %2074 }
 0xce2   :  { %926 = vrot.lane.b32.xlu0 %v2075_v62, %s2119_s16 }
 0xd54   :  { %v927_v63 = vpop.permute.xlu0 %926 }
 0xd55   :  { %v929_v0 = vmul.f32 %v927_v63, %v912_v55  ;;  %v126_v55 = vlaneseq }
 0xd57   :  { %932 = vrot.lane.b32.xlu1 %v929_v0, %s2120_s3  ;;  %v129_v56 = vshrl.u32 %v126_v55, 7  ;;  %v127_v51 = vand.u32 127, %v126_v55 }
 0xd59   :  { %v132_v58 = vadd.s32 1, %v129_v56  ;;  %v130_v59 = vmul.u32 10, %v129_v56  ;;  %vm835_vm8 = vcmp.eq.s32.totalorder %v129_v56, 0  ;;  %vm1516_vm9 = vcmp.eq.s32.totalorder %v129_v56, 1 }
 0xd5b   :  { %vm131_vm4 = vcmp.ge.s32.totalorder %v127_v51, %v130_v59 }
 0xdc9   :  { %v933_v1 = vpop.permute.xlu1 %932 }
 0xdca   :  { %1858 = vmatmul.mubr.msk.f32.vlgmr.msra.gmra.mrb[10].mxu0 %vm137_vm2, %v933_v1 }
 0xdcb   :  { %2013 = vmatpush3.bf16.msra.mxu0 %v2179_v7  ;;  %1890 = vmatprep.mubr.msk.f32.mxu0 %vm2117_vm1, %v2118_v10 }
 0xdcc   :  { %2014 = vmatprep.subr.bf16.mxu0 %v2116_v4 }
 0xdcf   :  { %2016 = vmatpush3.bf16.msra.mxu0 %v2193_v12 }
 0xdd0   :  { %2023 = vmatprep.subr.bf16.mxu0 %v2116_v4 }
 0xe9d   :  { %v1002_v3 = vpop.f32.mrb[10].mxu0 }
 0xe9e   :  { %v1006_v5 = vadd.f32 %v1002_v3, %v930_v2  ;;  %v1859_v6 = vpop.f32.mrb[11].mxu0 }
 0xea0   :  { %2076 = vtanh.f32 %v1006_v5 }
 0xeaa   :  { %v2077_v8 = vpop.eup %2076 }
 0xeab   :  { %1012 = vrot.lane.b32.xlu0 %v2077_v8, %s2119_s16  ;;  %v1008_v9 = vmul.f32 0.5, %v2077_v8 }
 0xead   :  { %v1009_v11 = vadd.f32 0.5, %v1008_v9 }
 0xeaf   :  { %v1010_v15 = vmul.f32 %v1009_v11, %v923_v60  ;;  %v133_v60 = vmul.u32 10, %v132_v58 }
 0xeb1   :  { %vm134_vm5 = vcmp.lt.s32.totalorder %v127_v51, %v133_v60 }
 0xeb2   :  { %vm135_vm6 = vmand %vm131_vm4, %vm134_vm5 }
 0xeb3   :  { %v826_v62 = vsel %vm135_vm6, %v2352_v46, 0.0 }
 0xeb4   :  { %v828_v63 = vsel %vm827_vm7, %v826_v62, 0.0 }
 0xf1d   :  { %v1013_v13 = vpop.permute.xlu0 %1012 }
 0xf1e   :  { %v1015_v14 = vmul.f32 %v1013_v13, %v1009_v11 }
 0xf20   :  { %1017 = vrot.lane.b32.xlu1 %v1015_v14, %s2119_s16 }
 0xf92   :  { %v1018_v16 = vpop.permute.xlu1 %1017 }
 0xf93   :  { %v1020_v18 = vadd.f32 %v1018_v16, %v1010_v15 }
 0xf95   :  { %2078 = vtanh.f32 %v1020_v18 }
 0xf9f   :  { %v2079_v20 = vpop.eup %2078 }
 0xfa0   :  { %1023 = vrot.lane.b32.xlu0 %v2079_v20, %s2119_s16 }
0x1012   :  { %v1024_v21 = vpop.permute.xlu0 %1023 }
0x1013   :  { %v1026_v22 = vmul.f32 %v1024_v21, %v1009_v11 }
0x1015   :  { %1028 = vrot.lane.b32.xlu1 %v1026_v22, %s2120_s3 }
0x1087   :  { %v1029_v23 = vpop.permute.xlu1 %1028 }
0x1088   :  { %1869 = vmatmul.mubr.msk.f32.vlgmr.msra.gmra.mrb[4].mxu1 %vm137_vm2, %v1029_v23  ;;  %1891 = vmatmul.mubr.msk.f32.vlgmr.msra.gmra.mrb[12].mxu0 %vm137_vm2, %v1029_v23  ;;  %v1652_v23 = vld [vmem:[%s2443_s6] ss:$0 sm:$0xff]  ;;  %s2092_s6 = scalar_lea.vmem %s1627_s29, 32 }
0x1089   :  { %2007 = vmatpush3.bf16.msra.mxu1 %v2253_v57  ;;  %1879 = vmatprep.mubr.msk.f32.mxu1 %vm2117_vm1, %v2118_v10  ;;  %p2093_p0 = scmp.ne.s32.totalorder %s1627_s29, %s2092_s6  ;;  %p2098_p2 = scmp.lt.s32.totalorder %s2092_s6, %s2092_s6 }
0x108a   :  { %2008 = vmatprep.subr.bf16.mxu1 %v2116_v4  ;;  %2025 = vmatpush3.bf16.msra.mxu0 %v2179_v7  ;;  %v1172_v7 = vld [vmem:[#allocation2 + $0xc] sm:$0x3] }
0x108b   :  { %2026 = vmatprep.subr.bf16.mxu0 %v2116_v4  ;;  %1912 = vmatprep.mubr.msk.f32.mxu0 %vm2117_vm1, %v2118_v10  ;;  %p2099_p3 = por %p2098_p2, %p2097_p1 }
0x108d   :  { %2010 = vmatpush3.bf16.msra.mxu1 %v2264_v61  ;;  %p2100_p4 = pnand %p2099_p3, %p2093_p0 }
0x108e   :  { %2017 = vmatprep.subr.bf16.mxu1 %v2116_v4  ;;  %2028 = vmatpush3.bf16.msra.mxu0 %v2193_v12 }
0x108f   :  { %2035 = vmatprep.subr.bf16.mxu0 %v2116_v4 }
0x1090   :  { %1880 = vmatmul.mubr.msk.f32.vlgmr.msra.gmra.mrb[4].mxu1 %vm137_vm2, %v933_v1 }
0x1091   :  { %2019 = vmatpush3.bf16.msra.mxu1 %v2291_v17  ;;  %1901 = vmatprep.mubr.msk.f32.mxu1 %vm2117_vm1, %v2118_v10 }
0x1092   :  { %2020 = vmatprep.subr.bf16.mxu1 %v2116_v4 }
0x1095   :  { %2022 = vmatpush3.bf16.msra.mxu1 %v2297_v19 }
0x1096   :  { %2029 = vmatprep.subr.bf16.mxu1 %v2116_v4 }
0x115b   :  { %v1239_v57 = vpop.f32.mrb[12].mxu0 }
0x115c   :  { %v1243_v61 = vadd.f32 %v1239_v57, %v1172_v7  ;;  %v1892_v24 = vpop.f32.mrb[13].mxu0 }
0x115e   :  { %2080 = vtanh.f32 %v1243_v61 }
0x1168   :  { %v2081_v12 = vpop.eup %2080 }
0x1169   :  { %1249 = vrot.lane.b32.xlu0 %v2081_v12, %s2119_s16  ;;  %v1245_v25 = vmul.f32 0.5, %v2081_v12 }
0x116b   :  { %v1246_v26 = vadd.f32 0.5, %v1245_v25 }
0x116d   :  { %v1247_v28 = vmul.f32 %v1246_v26, %v1020_v18 }
0x11db   :  { %v1250_v17 = vpop.permute.xlu0 %1249 }
0x11dc   :  { %v1252_v27 = vmul.f32 %v1250_v17, %v1246_v26 }
0x11de   :  { %1254 = vrot.lane.b32.xlu1 %v1252_v27, %s2119_s16 }
0x1250   :  { %v1255_v29 = vpop.permute.xlu1 %1254 }
0x1251   :  { %v1257_v30 = vadd.f32 %v1255_v29, %v1247_v28 }
0x1253   :  { %2082 = vtanh.f32 %v1257_v30 }
0x125d   :  { %v2083_v19 = vpop.eup %2082 }
0x125e   :  { %1260 = vrot.lane.b32.xlu0 %v2083_v19, %s2119_s16 }
0x12d0   :  { %v1261_v31 = vpop.permute.xlu0 %1260 }
0x12d1   :  { %v1263_v32 = vmul.f32 %v1261_v31, %v1246_v26 }
0x12d3   :  { %1265 = vrot.lane.b32.xlu1 %v1263_v32, %s2120_s3 }
0x1345   :  { %v1266_v33 = vpop.permute.xlu1 %1265 }
0x1346   :  { %1902 = vmatmul.mubr.msk.f32.vlgmr.msra.gmra.mrb[4].mxu1 %vm137_vm2, %v1266_v33  ;;  %1913 = vmatmul.mubr.msk.f32.vlgmr.msra.gmra.mrb[14].mxu0 %vm137_vm2, %v1266_v33 }
0x1347   :  { %2031 = vmatpush3.bf16.msra.mxu1 %v2325_v39  ;;  %1923 = vmatprep.mubr.msk.f32.mxu1 %vm2117_vm1, %v2118_v10 }
0x1348   :  { %2032 = vmatprep.subr.bf16.mxu1 %v2116_v4  ;;  %1932 = vmatprep.mubr.msk.f32.mxu0 %vm2117_vm1, %v2118_v10 }
0x1349   :  { %2037 = vmatpush3.bf16.msra.mxu0 %v2036_v53 }
0x134a   :  { %1930 = vmatprep.subr.mxu0 %v2118_v10  ;;  %v829_v10 = vrot.slane %v828_v63, 4 }
0x134b   :  { %2034 = vmatpush3.bf16.msra.mxu1 %v2331_v41 }
0x134c   :  { %v830_v0 = vadd.f32 %v829_v10, %v828_v63 }
0x134d   :  { %1931 = vmatpush3.msk.msra.mxu0 %vm1533_vm3, %v1521_v54 }
0x134e   :  { %v831_v1 = vrot.slane %v830_v0, 2 }
0x1350   :  { %v832_v8 = vadd.f32 %v831_v1, %v830_v0 }
0x1352   :  { %v833_v13 = vrot.slane %v832_v8, 1 }
0x1354   :  { %v834_v16 = vadd.f32 %v833_v13, %v832_v8 }
0x1356   :  { %v836_v20 = vsel %vm835_vm8, %v834_v16, 0.0 }
0x1419   :  { %v1407_v35 = vpop.f32.mrb[14].mxu0 }
0x141a   :  { %v1411_v36 = vadd.f32 %v1407_v35, %v1340_v34  ;;  %v1914_v37 = vpop.f32.mrb[15].mxu0 }
0x141c   :  { %2084 = vtanh.f32 %v1411_v36 }
0x1426   :  { %v2085_v38 = vpop.eup %2084 }
0x1427   :  { %1417 = vrot.lane.b32.xlu0 %v2085_v38, %s2119_s16  ;;  %v1413_v40 = vmul.f32 0.5, %v2085_v38 }
0x1429   :  { %v1414_v39 = vadd.f32 0.5, %v1413_v40 }
0x142b   :  { %v1415_v4 = vmul.f32 %v1414_v39, %v1257_v30 }
0x1499   :  { %v1418_v42 = vpop.permute.xlu0 %1417 }
0x149a   :  { %v1420_v43 = vmul.f32 %v1418_v42, %v1414_v39 }
0x149c   :  { %1422 = vrot.lane.b32.xlu1 %v1420_v43, %s2119_s16 }
0x150e   :  { %v1423_v44 = vpop.permute.xlu1 %1422 }
0x150f   :  { %v1425_v45 = vadd.f32 %v1423_v44, %v1415_v4 }
0x1511   :  { %2086 = vtanh.f32 %v1425_v45 }
0x151b   :  { %v2087_v47 = vpop.eup %2086 }
0x151c   :  { %1428 = vrot.lane.b32.xlu0 %v2087_v47, %s2119_s16 }
0x158e   :  { %v1429_v41 = vpop.permute.xlu0 %1428 }
0x158f   :  { %v1431_v48 = vmul.f32 %v1429_v41, %v1414_v39 }
0x1591   :  { %1433 = vrot.lane.b32.xlu1 %v1431_v48, %s2120_s3 }
0x1603   :  { %v1434_v50 = vpop.permute.xlu1 %1433 }
0x1604   :  { %1924 = vmatmul.mubr.msk.f32.vlgmr.msra.gmra.mrb[4].mxu1 %vm137_vm2, %v1434_v50 }
0x16d7   :  { %v1503_v2 = vpop.f32.mrb[4].mxu1 }
0x16d8   :  { %v1508_v3 = vsel %vm135_vm6, %v1503_v2, 0.0  ;;  %v1925_v5 = vpop.f32.mrb[5].mxu1 }
0x16d9   :  { %v1509_v6 = vsel %vm827_vm7, %v1508_v3, 0.0 }
0x16da   :  { %v1510_v9 = vrot.slane %v1509_v6, 4 }
0x16dc   :  { %v1511_v11 = vadd.f32 %v1510_v9, %v1509_v6 }
0x16de   :  { %v1512_v14 = vrot.slane %v1511_v11, 2 }
0x16e0   :  { %v1513_v15 = vadd.f32 %v1512_v14, %v1511_v11 }
0x16e2   :  { %v1514_v18 = vrot.slane %v1513_v15, 1 }
0x16e4   :  { %v1515_v46 = vadd.f32 %v1514_v18, %v1513_v15 }
0x16e6   :  { %v1517_v21 = vsel %vm1516_vm9, %v1515_v46, 0.0 }
0x16e7   :  { %v1518_v22 = vadd.f32 %v1517_v21, %v836_v20 }
0x16e9   :  { %1933 = vmatmul.mubr.msk.f32.vlgmr.msra.gmra.mrb[16].mxu0 %vm1529_vm10, %v1518_v22 }
0x17bc   :  { %v1603_v7 = vpop.f32.mrb[16].mxu0 }
0x17bd   :  { %v1604_v57 = vadd.f32 %v1652_v23, %v1603_v7  ;;  %v1934_v61 = vpop.f32.mrb[17].mxu0 }
0x17bf   :  { %v1608_v24 = vsel %vm1607_vm11, %v1604_v57, -inf }
0x17c0   :  { %1609 = vmax.xlane.f32.xlu0 %v1608_v24 }
0x184d   :  { %v1610_v12 = vpop.xlane.xlu0 %1609 }
0x184e   :  { %v1611_v25 = vsub.f32 %v1604_v57, %v1610_v12 }
0x1850   :  { %v1612_v26 = vmul.f32 1.442695, %v1611_v25 }
0x1852   :  { %2088 = vpow2.f32 %v1612_v26 }
0x185c   :  { %v2089_v17 = vpop.eup %2088 }
0x185d   :  { %v1614_v27 = vsel %vm1607_vm11, %v2089_v17, 0.0 }
0x185e   :  { %1615 = vadd.xlane.f32.xlu1 %v1614_v27 }
0x18eb   :  { %v1616_v28 = vpop.xlane.xlu1 %1615 }
0x18ec   :  { %2090 = vrcp.f32 %v1616_v28 }
0x18f6   :  { %v2091_v29 = vpop.eup %2090 }
0x18f7   :  { %v1618_v30 = vmul.f32 %v2091_v29, %v2089_v17 }
0x18f9   :  { %1619 = vst.msk [vmem:[#allocation3] sm:$0x3] %vm1607_vm11, %v1618_v30 }
0x18fa   :  { %2103 = shalt.err (!%p2100_p4)
}
0x18fb   :  { %s2104_s9 = scalar_lea.hbm %s2444_s7, 32 }
0x18fc   :  { %p2105_p5 = scmp.ne.s32.totalorder %s2444_s7, %s2104_s9  ;;  %p2108_p6 = scmp.lt.u32.totalorder %s2104_s9, %s2444_s7 }
0x18fe   :  { %p2110_p7 = pnand %p2108_p6, %p2105_p5 }
0x1900   :  { %2113 = shalt.err (!%p2110_p7)
}
0x1901   :  { %1629 = dma.vmem_to_hbm [thread:$0]  %s1627_s29, 32, %s2444_s7, [#allocation4]  }
0x1902   :  { %2114 = dma.done.wait [#allocation4], 32  }
0x1903   :  { %2115 = vsyncadd [#allocation4], 4294967264 }
0x1904   :  { %1633 = vsyncpa [#allocation4], 1 }

</bundles_post_ra>
